<compile_context>
chip_gen: v6e
topology: v6e:2x2x1
jax: 0.10.0
libtpu: 0.0.40
codegen_flags: <defaults>
</compile_context>

<pallas_src>
import math

import jax
import jax.numpy as jnp
from jax.experimental import pallas as pl
from jax.experimental.pallas import tpu as pltpu

_MIB = 1024 * 1024


def _round_up(x, m):
    return (x + m - 1) // m * m


def _plan(c_in, c_hid, c_out, weight_itemsize, hidden_tile):
    """Padded (lane-dense) feature dims + hidden-tile size.

    Shared by `pad_mlp_params` and `mlp_pallas` so pre-padded params stay
    consistent with the kernel's tiling.
    """
    cin_p = _round_up(c_in, 128)
    chid_p = _round_up(c_hid, 128)
    cout_p = _round_up(c_out, 128)
    full_weight_bytes = (cin_p * chid_p + chid_p + chid_p * cout_p + cout_p) * weight_itemsize
    if chid_p <= hidden_tile or full_weight_bytes <= 24 * _MIB:
        tk = chid_p                    # small enough: weights stay fully resident
    else:
        tk = hidden_tile               # tile the hidden dim (fits v7x's 64 MiB VMEM)
        chid_p = _round_up(chid_p, tk)
    return cin_p, chid_p, cout_p, tk


def _pad2d(a, rows, cols):
    dr, dc = rows - a.shape[0], cols - a.shape[1]
    if dr == 0 and dc == 0:
        return a
    return jnp.pad(a, ((0, dr), (0, dc)))


def _pad_bias(b, cols):
    b = b.reshape(1, b.shape[-1])
    dc = cols - b.shape[1]
    if dc == 0:
        return b
    return jnp.pad(b, ((0, 0), (0, dc)))


def pad_mlp_params(w1, b1, w2, b2, *, hidden_tile=512):
    """Pad parameters ONCE at init (hoists HBM re-padding out of every forward).

    Returns (padded_params, dims); pass `dims=dims` to `mlp_pallas` together
    with the padded params (and the same `hidden_tile`).
    Zero padding is exact: padded input cols hit zero weight rows, padded
    hidden cols are gelu(0)=0 and hit zero w2 rows, padded rows are sliced off.
    """
    c_in, c_hid = w1.shape
    c_out = w2.shape[1]
    cin_p, chid_p, cout_p, _ = _plan(c_in, c_hid, c_out,
                                     jnp.dtype(w1.dtype).itemsize, hidden_tile)
    w1_p = _pad2d(w1, cin_p, chid_p)
    b1_p = _pad_bias(b1, chid_p)
    w2_p = _pad2d(w2, chid_p, cout_p)
    b2_p = _pad_bias(b2, cout_p)
    return (w1_p, b1_p, w2_p, b2_p), (c_in, c_hid, c_out)


def _make_mlp_kernel(matmul_dtype):
    def kernel(x_ref, w1_ref, b1_ref, w2_ref, b2_ref, o_ref, acc_ref):
        k = pl.program_id(1)

        @pl.when(k == 0)
        def _init():
            # Seed the fc2 accumulator with the fc2 bias.
            acc_ref[...] = jnp.broadcast_to(
                b2_ref[...].astype(jnp.float32), acc_ref.shape)

        x = x_ref[...]
        w1 = w1_ref[...]
        w2 = w2_ref[...]
        if matmul_dtype is not None:
            # bf16-native MXU fast path (f32 accumulation keeps accuracy).
            x = x.astype(matmul_dtype)
            w1 = w1.astype(matmul_dtype)
            w2 = w2.astype(matmul_dtype)
        elif x.dtype != w1.dtype:
            # Never silently mix dtypes in a single MXU pass.
            x = x.astype(w1.dtype)

        # fc1 for this hidden tile (full C_in reduction), f32 accumulation.
        h = jnp.dot(x, w1, preferred_element_type=jnp.float32)
        h = h + b1_ref[...].astype(jnp.float32)

        # Exact GELU (erf), matching PyTorch's default nn.GELU.
        # TODO(synk): on v5e, switch to the tanh approximation (EUP slot) if a
        # bundle dump ever shows the erf polynomial binding the VALU slot.
        h = 0.5 * h * (1.0 + jax.lax.erf(h * 0.7071067811865476))

        # fc2 partial product for this hidden tile, accumulated in f32.
        acc_ref[...] += jnp.dot(h.astype(w2.dtype), w2,
                                preferred_element_type=jnp.float32)

        @pl.when(k == pl.num_programs(1) - 1)
        def _finalize():
            o_ref[...] = acc_ref[...].astype(o_ref.dtype)

    return kernel


def mlp_pallas(x, w1, b1, w2, b2, *, row_tile=256, hidden_tile=512,
               matmul_dtype=None, dims=None):
    """x: (..., C_in).  Weights stored transposed ((in, out)) so the kernel
    computes x @ W directly.

    If `dims=(C_in, C_hid, C_out)` is given, the weights/biases are assumed to
    be pre-padded by `pad_mlp_params` (same `hidden_tile`); otherwise they are
    padded here.
    """
    orig_shape = x.shape
    n = math.prod(orig_shape[:-1])
    w_itemsize = jnp.dtype(w1.dtype).itemsize
    x_itemsize = jnp.dtype(x.dtype).itemsize

    if dims is None:
        (w1, b1, w2, b2), dims = pad_mlp_params(w1, b1, w2, b2, hidden_tile=hidden_tile)
    c_in, c_hid, c_out = dims
    cin_p, chid_p, cout_p, tk = _plan(c_in, c_hid, c_out, w_itemsize, hidden_tile)
    assert w1.shape == (cin_p, chid_p) and w2.shape == (chid_p, cout_p), (
        "pre-padded params must come from pad_mlp_params with the same hidden_tile")
    assert orig_shape[-1] == c_in

    # Row tile: big enough to fill the MXU / amortize ~0.35us per grid step,
    # clamped for tiny inputs; multiple of 16 for bf16 sublane packing.
    row_align = 16 if x.dtype == jnp.bfloat16 else 8
    tm = min(_round_up(row_tile, row_align), _round_up(n, row_align))
    n_pad = _round_up(n, tm)
    # Give the "parallel" row axis >= 2 steps so both v7x TensorCores get work.
    if n_pad // tm < 2 and tm > row_align:
        tm = _round_up(max(tm // 2, row_align), row_align)
        n_pad = _round_up(n, tm)

    x2d = x.reshape(n, c_in)
    if n_pad != n or cin_p != c_in:
        x2d = jnp.pad(x2d, ((0, n_pad - n), (0, cin_p - c_in)))

    n_rows = n_pad // tm
    n_k = chid_p // tk

    # --- generation-aware VMEM budget ---------------------------------------
    weight_step_bytes = (cin_p * tk + tk + tk * cout_p + cout_p) * w_itemsize
    weight_bufs = 1 if n_k == 1 else 2        # single-buffered when resident
    io_bytes = 2 * tm * (cin_p + cout_p) * x_itemsize  # double-buffered in/out tiles
    acc_bytes = tm * cout_p * 4
    h_bytes = tm * tk * 4                     # f32 fc1 intermediate
    needed = weight_bufs * weight_step_bytes + io_bytes + acc_bytes + h_bytes
    try:
        vmem_cap = pltpu.get_tpu_info().vmem_capacity_bytes
    except Exception:
        vmem_cap = 64 * _MIB                  # conservative (v7x) fallback
    vmem_ceiling = int(vmem_cap * 0.75)       # leave headroom for the pipeline
    vmem_limit = int(min(max(needed * 1.5, 16 * _MIB), vmem_ceiling))
    vmem_limit = max(vmem_limit, int(needed * 1.2))  # never under-budget

    # --- cost estimate for XLA scheduling ------------------------------------
    flops = 2 * n_pad * (cin_p * chid_p + chid_p * cout_p)
    transcendentals = n_pad * chid_p
    weight_total_bytes = (cin_p * chid_p + chid_p + chid_p * cout_p + cout_p) * w_itemsize
    weight_fetches = 1 if n_k == 1 else n_rows
    bytes_accessed = n_pad * (cin_p + cout_p) * x_itemsize + weight_fetches * weight_total_bytes

    # --- specs ---------------------------------------------------------------
    resident = pl.Buffered(1)

    def wspec(shape, index_map):
        # Weight tiles: single-buffer when their block index is constant
        # (n_k == 1), otherwise keep default double-buffering across k.
        if n_k == 1:
            return pl.BlockSpec(shape, index_map, pipeline_mode=resident)
        return pl.BlockSpec(shape, index_map)

    in_specs = [
        pl.BlockSpec((tm, cin_p), lambda i, k: (i, 0)),     # x rows (resident across k)
        wspec((cin_p, tk), lambda i, k: (0, k)),            # w1 hidden tile
        wspec((1, tk), lambda i, k: (0, k)),                # b1 hidden tile
        wspec((tk, cout_p), lambda i, k: (k, 0)),           # w2 hidden tile
        pl.BlockSpec((1, cout_p), lambda i, k: (0, 0),      # b2 (constant block)
                     pipeline_mode=resident),
    ]
    out_spec = pl.BlockSpec((tm, cout_p), lambda i, k: (i, 0))

    out2d = pl.pallas_call(
        _make_mlp_kernel(matmul_dtype),
        out_shape=jax.ShapeDtypeStruct((n_pad, cout_p), x.dtype),
        grid_spec=pltpu.PrefetchScalarGridSpec(
            num_scalar_prefetch=0,
            grid=(n_rows, n_k),
            in_specs=in_specs,
            out_specs=out_spec,
            scratch_shapes=[pltpu.VMEM((tm, cout_p), jnp.float32)],
        ),
        compiler_params=pltpu.CompilerParams(
            dimension_semantics=("parallel", "arbitrary"),
            vmem_limit_bytes=vmem_limit,
        ),
        cost_estimate=pl.CostEstimate(
            flops=flops,
            transcendentals=transcendentals,
            bytes_accessed=bytes_accessed,
        ),
    )(x2d, w1, b1, w2, b2)

    if n_pad != n or cout_p != c_out:
        out2d = out2d[:n, :c_out]
    return out2d.reshape(*orig_shape[:-1], c_out)


def init_mlp_params(key, in_features, hidden_features, out_features, dtype=jnp.float32):
    """Deterministic init matching nn.Linear shapes (weights stored transposed)."""
    k1, k2, k3, k4 = jax.random.split(key, 4)
    bound1 = 1.0 / jnp.sqrt(in_features)
    bound2 = 1.0 / jnp.sqrt(hidden_features)
    w1 = jax.random.uniform(k1, (in_features, hidden_features), dtype, -bound1, bound1)
    b1 = jax.random.uniform(k2, (hidden_features,), dtype, -bound1, bound1)
    w2 = jax.random.uniform(k3, (hidden_features, out_features), dtype, -bound2, bound2)
    b2 = jax.random.uniform(k4, (out_features,), dtype, -bound2, bound2)
    return w1, b1, w2, b2


def mlp_reference(x, w1, b1, w2, b2):
    """Pure-JAX reference for correctness checking."""
    h = jnp.einsum("...c,ch->...h", x, w1, precision="highest") + b1
    h = jax.nn.gelu(h, approximate=False)
    return jnp.einsum("...h,ho->...o", h, w2, precision="highest") + b2


if __name__ == "__main__":
    key = jax.random.PRNGKey(0)
    kx, kp = jax.random.split(key)

    B, S = 2, 8
    in_features, hidden_features, out_features = 32, 64, 32  # out defaults to in

    x = jax.random.normal(kx, (B, S, in_features), jnp.float32)
    w1, b1, w2, b2 = init_mlp_params(kp, in_features, hidden_features, out_features)
    ref = mlp_reference(x, w1, b1, w2, b2)

    # Pre-padded params: weight padding hoisted out of the per-call path.
    padded, dims = pad_mlp_params(w1, b1, w2, b2)

    out = jax.block_until_ready(mlp_pallas(x, *padded, dims=dims))
    assert out.shape == (B, S, out_features)
    assert jnp.allclose(out, ref, atol=1e-2, rtol=1e-2), "f32 path mismatch vs reference"

    # Auto-padding path (unpadded weights passed directly).
    out_auto = jax.block_until_ready(mlp_pallas(x, w1, b1, w2, b2))
    assert jnp.allclose(out_auto, ref, atol=1e-2, rtol=1e-2), "auto-pad path mismatch"

    # bf16 MXU fast path (f32 accumulation), looser tolerance.
    out_bf16 = jax.block_until_ready(
        mlp_pallas(x, *padded, dims=dims, matmul_dtype=jnp.bfloat16))
    assert jnp.allclose(out_bf16, ref, atol=5e-2, rtol=5e-2), "bf16 path mismatch"

    print("KERNEL_OK")
</pallas_src>

<mosaic_0001>
module attributes {stable_mosaic.version = 11 : i64} {
  func.func @kernel(%arg0: i32, %arg1: i32, %arg2: memref<8x128xf32, #tpu.memory_space<vmem>>, %arg3: memref<128x128xf32, #tpu.memory_space<vmem>>, %arg4: memref<1x128xf32, #tpu.memory_space<vmem>>, %arg5: memref<128x128xf32, #tpu.memory_space<vmem>>, %arg6: memref<1x128xf32, #tpu.memory_space<vmem>>, %arg7: memref<8x128xf32, #tpu.memory_space<vmem>>, %arg8: memref<8x128xf32, #tpu.memory_space<vmem>>) attributes {dimension_semantics = [#tpu.dimension_semantics<parallel>, #tpu.dimension_semantics<arbitrary>], iteration_bounds = array<i64: 2, 1>, scalar_prefetch = 0 : i64, scratch_operands = 1 : i64, tpu.core_type = #tpu.core_type<tc>, window_params = [{transform_indices = @transform_0, window_bounds = array<i64: 8, 128>}, {pipeline_mode = #tpu.pipeline_mode<synchronous>, transform_indices = @transform_1, window_bounds = array<i64: 128, 128>}, {pipeline_mode = #tpu.pipeline_mode<synchronous>, transform_indices = @transform_2, window_bounds = array<i64: 1, 128>}, {pipeline_mode = #tpu.pipeline_mode<synchronous>, transform_indices = @transform_3, window_bounds = array<i64: 128, 128>}, {pipeline_mode = #tpu.pipeline_mode<synchronous>, transform_indices = @transform_4, window_bounds = array<i64: 1, 128>}, {transform_indices = @transform_5, window_bounds = array<i64: 8, 128>}]} {
    %c0_i32 = arith.constant 0 : i32
    %0 = arith.cmpi eq, %arg1, %c0_i32 : i32
    %1 = arith.extui %0 : i1 to i32
    %c0_i32_0 = arith.constant 0 : i32
    %2 = arith.cmpi ne, %1, %c0_i32_0 : i32
    scf.if %2 {
      %c0_18 = arith.constant 0 : index
      %c0_19 = arith.constant 0 : index
      %25 = vector.load %arg6[%c0_18, %c0_19] : memref<1x128xf32, #tpu.memory_space<vmem>>, vector<1x128xf32>
      %26 = vector.shape_cast %25 : vector<1x128xf32> to vector<1x128xf32>
      %27 = vector.broadcast %26 : vector<1x128xf32> to vector<8x128xf32>
      %c0_20 = arith.constant 0 : index
      %c0_21 = arith.constant 0 : index
      %28 = vector.load %arg8[%c0_20, %c0_21] : memref<8x128xf32, #tpu.memory_space<vmem>>, vector<8x128xf32>
      tpu.vector_store %arg8[%c0_20, %c0_21], %27 {strides = array<i32>} : memref<8x128xf32, #tpu.memory_space<vmem>>, vector<8x128xf32>,
    } else {
    }
    %c0 = arith.constant 0 : index
    %c0_1 = arith.constant 0 : index
    %3 = vector.load %arg2[%c0, %c0_1] : memref<8x128xf32, #tpu.memory_space<vmem>>, vector<8x128xf32>
    %c0_2 = arith.constant 0 : index
    %c0_3 = arith.constant 0 : index
    %4 = vector.load %arg3[%c0_2, %c0_3] : memref<128x128xf32, #tpu.memory_space<vmem>>, vector<128x128xf32>
    %c0_4 = arith.constant 0 : index
    %c0_5 = arith.constant 0 : index
    %5 = vector.load %arg5[%c0_4, %c0_5] : memref<128x128xf32, #tpu.memory_space<vmem>>, vector<128x128xf32>
    %cst = arith.constant dense<0.000000e+00> : vector<8x128xf32>
    %6 = tpu.matmul %3, %4, %cst {dimension_numbers = #tpu.dot_dimension_numbers<[1], [0], [0], [1], [0, 0, 1, 1], [], []>} : vector<8x128xf32>, vector<128x128xf32>, vector<8x128xf32> -> vector<8x128xf32>
    %c0_6 = arith.constant 0 : index
    %c0_7 = arith.constant 0 : index
    %7 = vector.load %arg4[%c0_6, %c0_7] : memref<1x128xf32, #tpu.memory_space<vmem>>, vector<1x128xf32>
    %8 = vector.broadcast %7 : vector<1x128xf32> to vector<8x128xf32>
    %9 = arith.addf %6, %8 : vector<8x128xf32>
    %cst_8 = arith.constant 5.000000e-01 : f32
    %10 = vector.broadcast %cst_8 : f32 to vector<8x128xf32>
    %11 = arith.mulf %10, %9 : vector<8x128xf32>
    %cst_9 = arith.constant 0.707106769 : f32
    %12 = vector.broadcast %cst_9 : f32 to vector<8x128xf32>
    %13 = arith.mulf %9, %12 : vector<8x128xf32>
    %14 = math.erf %13 : vector<8x128xf32>
    %cst_10 = arith.constant 1.000000e+00 : f32
    %15 = vector.broadcast %cst_10 : f32 to vector<8x128xf32>
    %16 = arith.addf %15, %14 : vector<8x128xf32>
    %17 = arith.mulf %11, %16 : vector<8x128xf32>
    %c0_11 = arith.constant 0 : index
    %c0_12 = arith.constant 0 : index
    %18 = vector.load %arg8[%c0_11, %c0_12] : memref<8x128xf32, #tpu.memory_space<vmem>>, vector<8x128xf32>
    %cst_13 = arith.constant dense<0.000000e+00> : vector<8x128xf32>
    %19 = tpu.matmul %17, %5, %cst_13 {dimension_numbers = #tpu.dot_dimension_numbers<[1], [0], [0], [1], [0, 0, 1, 1], [], []>} : vector<8x128xf32>, vector<128x128xf32>, vector<8x128xf32> -> vector<8x128xf32>
    %20 = arith.addf %18, %19 : vector<8x128xf32>
    %c0_14 = arith.constant 0 : index
    %c0_15 = arith.constant 0 : index
    %21 = vector.load %arg8[%c0_14, %c0_15] : memref<8x128xf32, #tpu.memory_space<vmem>>, vector<8x128xf32>
    tpu.vector_store %arg8[%c0_14, %c0_15], %20 {strides = array<i32>} : memref<8x128xf32, #tpu.memory_space<vmem>>, vector<8x128xf32>,
    %c0_i32_16 = arith.constant 0 : i32
    %22 = arith.cmpi eq, %arg1, %c0_i32_16 : i32
    %23 = arith.extui %22 : i1 to i32
    %c0_i32_17 = arith.constant 0 : i32
    %24 = arith.cmpi ne, %23, %c0_i32_17 : i32
    scf.if %24 {
      %c0_18 = arith.constant 0 : index
      %c0_19 = arith.constant 0 : index
      %25 = vector.load %arg8[%c0_18, %c0_19] : memref<8x128xf32, #tpu.memory_space<vmem>>, vector<8x128xf32>
      %c0_20 = arith.constant 0 : index
      %c0_21 = arith.constant 0 : index
      %26 = vector.load %arg7[%c0_20, %c0_21] : memref<8x128xf32, #tpu.memory_space<vmem>>, vector<8x128xf32>
      tpu.vector_store %arg7[%c0_20, %c0_21], %25 {strides = array<i32>} : memref<8x128xf32, #tpu.memory_space<vmem>>, vector<8x128xf32>,
    } else {
    }
    return
  }
  func.func @transform_0(%arg0: i32, %arg1: i32) -> (i32, i32) {
    %c0_i32 = arith.constant 0 : i32
    %c0_i32_0 = arith.constant 0 : i32
    return %arg0, %c0_i32 : i32, i32
  }
  func.func @transform_1(%arg0: i32, %arg1: i32) -> (i32, i32) {
    %c0_i32 = arith.constant 0 : i32
    %c0_i32_0 = arith.constant 0 : i32
    return %c0_i32, %arg1 : i32, i32
  }
  func.func @transform_2(%arg0: i32, %arg1: i32) -> (i32, i32) {
    %c0_i32 = arith.constant 0 : i32
    %c0_i32_0 = arith.constant 0 : i32
    return %c0_i32, %arg1 : i32, i32
  }
  func.func @transform_3(%arg0: i32, %arg1: i32) -> (i32, i32) {
    %c0_i32 = arith.constant 0 : i32
    %c0_i32_0 = arith.constant 0 : i32
    return %arg1, %c0_i32 : i32, i32
  }
  func.func @transform_4(%arg0: i32, %arg1: i32) -> (i32, i32) {
    %c0_i32 = arith.constant 0 : i32
    %c0_i32_0 = arith.constant 0 : i32
    %c0_i32_1 = arith.constant 0 : i32
    return %c0_i32, %c0_i32_0 : i32, i32
  }
  func.func @transform_5(%arg0: i32, %arg1: i32) -> (i32, i32) {
    %c0_i32 = arith.constant 0 : i32
    %c0_i32_0 = arith.constant 0 : i32
    return %arg0, %c0_i32 : i32, i32
  }
}

</mosaic_0001>

<bundles_post_ra>
// kernel: tpu_custom_call.1
= control target key start
LH: loop header
LB: loop body
LE: loop exit
PB: predicated region body
PF: predicated region fallthrough
CT: control target
= control target key end

     0   :  { %s1287_s0 = inlined_call_operand.hbm [shape: f32[16,128], index: 0, kind: input, shape index: {}]   ;;  %s1288_s1 = inlined_call_operand.hbm [shape: f32[128,128], index: 1, kind: input, shape index: {}]   ;;  %s1289_s2 = inlined_call_operand.vmem [shape: f32[1,128], index: 2, kind: input, shape index: {}]   ;;  %s1290_s3 = inlined_call_operand.hbm [shape: f32[128,128], index: 3, kind: input, shape index: {}]   ;;  %s1291_s4 = inlined_call_operand.vmem [shape: f32[1,128], index: 4, kind: input, shape index: {}]   ;;  %s1292_s5 = inlined_call_operand.hbm [shape: f32[16,128], index: 5, kind: output, shape index: {}]  }
   0x1   :  { %1296 = sst [smem:[#allocation13_spill]] %s1288_s1 }
   0x2   :  { %10 = vsyncpa [#allocation4], 0 }
   0x3   :  { %12 = vsyncpa [#allocation4 + $0x1], 0 }
   0x4   :  { %13 = vsyncpa [#allocation7], 0 }
   0x5   :  { %14 = vsyncpa [#allocation5], 0 }
   0x6   :  { %16 = vsyncpa [#allocation5 + $0x1], 0  ;;  %s1060_s18 = smov 0   ;;  %s1062_s19 = smov 0  }
   0x7   :  { %s1064_s20 = smov 0   ;;  %s1066_s21 = smov 0  }
   0x8   :  { %s1068_s22 = smov 0   ;;  %s1070_s23 = smov 0  }
   0x9 LB: > { %s643_s24 = sadd.s32 4294967295, %s1020_s23   ;;  %s644_s25 = sadd.s32 4294967294, %s1020_s23   ;;  %s1020_s23 = sphi %s1070_s23, %s22_s23   ;;  %s1016_s22 = sphi %s1068_s22, %s1314_s22   ;;  %s1012_s21 = sphi %s1066_s21, %s1313_s21   ;;  %s1008_s20 = sphi %s1064_s20, %s1312_s20   ;;  %s1004_s19 = sphi %s1062_s19, %s1311_s19   ;;  %s1000_s18 = sphi %s1060_s18, %s1310_s18  }
   0xa   : > { %p54_p0 = scmp.ne.s32.totalorder %s1004_s19, %s1000_s18  ;;  %p1094_p1 = scmp.eq.s32.totalorder %s643_s24, 0 }
   0xb   : > { %p1098_p2 = scmp.eq.s32.totalorder %s643_s24, 1  ;;  %p183_p3 = scmp.eq.s32.totalorder %s644_s25, 1 }
   0xc   : > { %s1297_s26 = scalar_select %p1094_p1, 1, 0 }
   0xd   : > { %p1104_p4 = por %p1094_p1, %p54_p0  ;;  %p645_p5 = scmp.ge.s32.totalorder %s1020_s23, 1 }
   0xe   : > { %p1109_p6 = por %p183_p3, %p54_p0  ;;  %p190_p7 = scmp.lt.s32.totalorder %s1020_s23, 3 }
   0xf   : > { %s1299_s28 = scalar_select %p1104_p4, 1, 0 }
  0x10   : > { %s1300_s29 = scalar_select %p1109_p6, 1, 0 }
  0x11   : > { %p1114_p8 = pnand %p645_p5, %p190_p7  ;;  %s1022_s6 = smov [#allocation6]  }
  0x12   : > { %s204_s7 = sshll.u32 %s1022_s6, 4  ;;  %s1023_s9 = smov [#allocation8]   ;;  %s205_s7 = int_to_ptr.vmem [resolvable:$true] %s204_s7 }
  0x13   : > { %p779_p9 = pneg %p1114_p8  ;;  %s226_s10 = sshll.u32 %s1023_s9, 4  ;;  %s227_s10 = int_to_ptr.vmem [resolvable:$true] %s226_s10 }
  0x14   : > { %s867_s11 = scalar_lea.vmem %s205_s7, 2048  ;;  %p875_p5 = scmp.lt.s32.totalorder %s205_s7, %s205_s7 }
  0x15   : > { %p1123_p11 = pnand %p779_p9, %p1094_p1  ;;  %p868_p13 = scmp.ne.s32.totalorder %s205_s7, %s867_s11 }
  0x16   : > { %p876_p7 = scmp.lt.s32.totalorder %s867_s11, %s867_s11 }
  0x17   : > { %p858_p12 = pneg %p1123_p11 }
  0x18   : > { %p877_p10 = por %p876_p7, %p875_p5 }
  0x19   : > { %p870_p0 = pnand %p868_p13, %p858_p12 }
  0x1b   : > { %p871_p3 = pneg %p870_p0 }
  0x1d   : > { %p878_p9 = pnand %p877_p10, %p871_p3 }
  0x1f   : > { %881 = shalt.err (!%p878_p9)
}
  0x20   : > { %s1024_s12 = smov 128   ;;  %s1025_s13 = smov 8  }
  0x21   : > { %s1303_s1 = sld [smem:[#allocation13_spill]]  ;;  %s893_s16 = scalar_lea.vmem %s227_s10, 2048 }
  0x22   : > { %p894_p6 = scmp.ne.s32.totalorder %s227_s10, %s893_s16  ;;  %p901_p1 = scmp.lt.s32.totalorder %s227_s10, %s227_s10 }
  0x23   : > { %p902_p4 = scmp.lt.s32.totalorder %s893_s16, %s893_s16 }
  0x24   : > { %p896_p13 = pnand %p894_p6, %p858_p12 }
  0x25   : > { %p903_p5 = por %p902_p4, %p901_p1 }
  0x26   : > { %p897_p0 = pneg %p896_p13 }
  0x27   : > { %782 = dma.hbm_to_vmem [thread:$0]  (!%p1123_p11), %s1303_s1, 2048, %s205_s7, [#allocation7], %s1024_s12, %s1024_s12, %s1025_s13  }
  0x28   : > { %p904_p10 = pnand %p903_p5, %p897_p0 }
  0x2a   : > { %907 = shalt.err (!%p904_p10)
}
  0x2b   : > { %785 = dma.hbm_to_vmem [thread:$0]  (!%p1123_p11), %s1290_s3, 2048, %s227_s10, [#allocation7], %s1024_s12, %s1024_s12, %s1025_s13  }
  0x2c   : > { %s34_s25 = sadd.s32 1, %s1016_s22  ;;  %s41_s6 = sadd.s32 1, %s1008_s20 }
  0x2d   : > { %p36_p1 = scmp.ge.s32.totalorder %s34_s25, 2  ;;  %p48_p4 = scmp.ne.s32.totalorder %s1008_s20, %s1004_s19 }
  0x2e   : > { %p49_p6 = scmp.eq.s32.totalorder %s1020_s23, 0  ;;  %p796_p12 = scmp.lt.s32.totalorder %s1020_s23, 2 }
  0x2f   : > { %s1316_s25 = smov (%p36_p1, %s34_s25), 0  ;;  %p1155_p7 = por %p1098_p2, %p48_p4 }
  0x30   : > { %p50_p3 = por %p49_p6, %p48_p4  ;;  %s38_s8 = ssub.s32 %s1016_s22, %s1316_s25 }
  0x31   : > { %s243_s9 = sand.u32 1, %s1008_s20   ;;  %p39_p9 = scmp.eq.s32.totalorder %s38_s8, 0 }
  0x32   : > { %s650_s10 = sshll.u32 %s243_s9, 3  ;;  %s651_s11 = sshll.u32 %s1016_s22, 7 }
  0x33   : > { %s1164_s12 = scalar_select %p39_p9, %s1008_s20, %s41_s6  }
  0x34   : > { %s252_s15 = scalar_lea.hbm %s1287_s0, %s651_s11  ;;  %s247_s16 = scalar_lea.vmem [#allocation3], %s650_s10 }
  0x35   : > { %s254_s17 = sshll.u32 %s247_s16, 4  ;;  %p1171_p11 = pnand %p796_p12, %p50_p3  ;;  %s255_s17 = int_to_ptr.vmem [resolvable:$true] %s254_s17 }
  0x36   : > { %s244_s24 = scalar_lea.sflag [#allocation4], %s243_s9  ;;  %s921_s8 = scalar_lea.vmem %s255_s17, 128 }
  0x37   : > { %p910_p2 = pneg %p1171_p11  ;;  %p922_p13 = scmp.ne.s32.totalorder %s255_s17, %s921_s8 }
  0x38   : > { %s1026_s6 = smov [#allocation3]  }
  0x39   : > { %p924_p0 = pnand %p922_p13, %p910_p2  ;;  %s926_s1 = sshll.u32 %s1026_s6, 4  ;;  %s927_s1 = int_to_ptr.vmem [resolvable:$false] %s926_s1 }
  0x3a   : > { %s928_s11 = scalar_lea.vmem %s927_s1, 256  ;;  %p929_p10 = scmp.lt.s32.totalorder %s255_s17, %s927_s1 }
  0x3b   : > { %p925_p5 = pneg %p924_p0  ;;  %p930_p1 = scmp.lt.s32.totalorder %s928_s11, %s921_s8 }
  0x3d   : > { %p931_p4 = por %p930_p1, %p929_p10 }
  0x3f   : > { %p932_p6 = pnand %p931_p4, %p925_p5 }
  0x41   : > { %935 = shalt.err (!%p932_p6)
}
  0x42   : > { %789 = dma.hbm_to_vmem [thread:$0]  (!%p1171_p11), %s252_s15, 128, %s255_s17, %s244_s24  }
  0x43   : > { %263 = sbr.rel (%p1114_p8) target bundleno = 533 (0x215), region = 40  ;;  %s1182_s9 = sand.u32 (!%p1114_p8), 1, %s1004_s19  }
  0x44   : > { %s653_s10 = sshll.u32 (!%p1114_p8), %s1182_s9, 3  ;;  %s266_s13 = scalar_lea.sflag (!%p1114_p8), [#allocation4], %s1182_s9 }
  0x45   : > { %s1188_s1 = scalar_lea.vmem (!%p1114_p8), [#allocation3], %s653_s10  ;;  %p1306_p12 = scmp.ne.s32.totalorder (!%p1114_p8), %s1299_s28, 0 }
  0x48   : > { %987 = dma.done.wait (%p1306_p12), %s266_s13, 128  }
  0x49   : > { %989 = vsyncadd (%p1306_p12), %s266_s13, 4294967168  ;;  %p1307_p3 = scmp.ne.s32.totalorder %s1297_s26, 0 }
  0x4b   : > { %991 = dma.done.wait (%p1307_p3), [#allocation7], 4096  }
  0x4c   : > { %993 = vsyncadd (%p1307_p3), [#allocation7], 4294963200  ;;  %v1027_v0 = vmov 0.0   ;;  %vm1028_vm0 = vmmov 0   ;;  %v339_v1 = vld [vmem:[#allocation6 + $0x78] sm:$0xff]  ;;  %v338_v2 = vld [vmem:[#allocation6 + $0x70] sm:$0xff] }
  0x4d   : > { %697 = vmatprep.subr.mxu0 %v1027_v0  ;;  %729 = vmatprep.mubr.msk.f32.mxu0 %vm1028_vm0, %v1027_v0  ;;  %v337_v3 = vld [vmem:[#allocation6 + $0x68] sm:$0xff]  ;;  %v336_v4 = vld [vmem:[#allocation6 + $0x60] sm:$0xff]  ;;  %v355_v5 = vld [vmem:[#allocation8 + $0x78] sm:$0xff]  ;;  %s660_s15 = sshll.u32 %s1012_s21, 7  ;;  %s306_s16 = scalar_lea.vmem [#allocation9], %s653_s10 }
  0x4e   : > { %732 = vmatprep.subr.mxu1 %v1027_v0  ;;  %764 = vmatprep.mubr.msk.f32.mxu1 %vm1028_vm0, %v1027_v0  ;;  %v335_v6 = vld [vmem:[#allocation6 + $0x58] sm:$0xff]  ;;  %v354_v7 = vld [vmem:[#allocation8 + $0x70] sm:$0xff]  ;;  %v353_v8 = vld [vmem:[#allocation8 + $0x68] sm:$0xff]  ;;  %s530_s17 = sshll.u32 %s306_s16, 4  ;;  %s1245_s8 = scalar_lea.hbm %s1292_s5, %s660_s15  ;;  %s531_s17 = int_to_ptr.vmem [resolvable:$true] %s530_s17 }
  0x4f   : > { %698 = vmatpush3.msra.mxu0 %v339_v1  ;;  %733 = vmatpush3.msra.mxu1 %v355_v5  ;;  %v334_v9 = vld [vmem:[#allocation6 + $0x50] sm:$0xff]  ;;  %v352_v10 = vld [vmem:[#allocation8 + $0x60] sm:$0xff]  ;;  %v333_v11 = vld [vmem:[#allocation6 + $0x48] sm:$0xff]  ;;  %s517_s6 = scalar_lea.sflag [#allocation5], %s1182_s9  ;;  %s936_s11 = scalar_lea.vmem %s531_s17, 128 }
  0x50   : > { %699 = vmatprep.subr.mxu0 %v1027_v0  ;;  %734 = vmatprep.subr.mxu1 %v1027_v0  ;;  %v332_v12 = vld [vmem:[#allocation6 + $0x40] sm:$0xff]  ;;  %v331_v13 = vld [vmem:[#allocation6 + $0x38] sm:$0xff]  ;;  %v330_v14 = vld [vmem:[#allocation6 + $0x30] sm:$0xff]  ;;  %p937_p8 = scmp.ne.s32.totalorder %s531_s17, %s936_s11  ;;  %s1029_s21 = smov [#allocation9]  }
  0x51   : > { %700 = vmatpush3.msra.mxu0 %v338_v2  ;;  %735 = vmatpush3.msra.mxu1 %v354_v7  ;;  %v329_v15 = vld [vmem:[#allocation6 + $0x28] sm:$0xff]  ;;  %v328_v16 = vld [vmem:[#allocation6 + $0x20] sm:$0xff]  ;;  %v327_v17 = vld [vmem:[#allocation6 + $0x18] sm:$0xff]  ;;  %s940_s13 = sshll.u32 %s1029_s21, 4  ;;  %s941_s13 = int_to_ptr.vmem [resolvable:$false] %s940_s13 }
  0x52   : > { %701 = vmatprep.subr.mxu0 %v1027_v0  ;;  %736 = vmatprep.subr.mxu1 %v1027_v0  ;;  %v326_v18 = vld [vmem:[#allocation6 + $0x10] sm:$0xff]  ;;  %v325_v19 = vld [vmem:[#allocation6 + $0x8] sm:$0xff]  ;;  %v324_v20 = vld [vmem:[#allocation6] sm:$0xff]  ;;  %p938_p9 = pnand %p937_p8, %p1155_p7  ;;  %s942_s10 = scalar_lea.vmem %s941_s13, 256 }
  0x53   : > { %702 = vmatpush3.msra.mxu0 %v337_v3  ;;  %737 = vmatpush3.msra.mxu1 %v353_v8  ;;  %v323_v21 = vld [vmem:[%s1188_s1] sm:$0xff]  ;;  %v349_v24 = vld [vmem:[#allocation8 + $0x48] sm:$0xff]  ;;  %v348_v25 = vld [vmem:[#allocation8 + $0x40] sm:$0xff]  ;;  %p943_p2 = scmp.lt.s32.totalorder %s531_s17, %s941_s13  ;;  %p944_p13 = scmp.lt.s32.totalorder %s942_s10, %s936_s11 }
  0x54   : > { %703 = vmatprep.subr.mxu0 %v1027_v0  ;;  %738 = vmatprep.subr.mxu1 %v1027_v0  ;;  %v351_v22 = vld [vmem:[#allocation8 + $0x58] sm:$0xff]  ;;  %v350_v23 = vld [vmem:[#allocation8 + $0x50] sm:$0xff]  ;;  %v345_v28 = vld [vmem:[#allocation8 + $0x28] sm:$0xff]  ;;  %p939_p11 = pneg %p938_p9 }
  0x55   : > { %704 = vmatpush3.msra.mxu0 %v336_v4  ;;  %739 = vmatpush3.msra.mxu1 %v352_v10  ;;  %v347_v26 = vld [vmem:[#allocation8 + $0x38] sm:$0xff]  ;;  %v346_v27 = vld [vmem:[#allocation8 + $0x30] sm:$0xff]  ;;  %v344_v29 = vld [vmem:[#allocation8 + $0x20] sm:$0xff]  ;;  %p945_p0 = por %p944_p13, %p943_p2 }
  0x56   : > { %705 = vmatprep.subr.mxu0 %v1027_v0  ;;  %740 = vmatprep.subr.mxu1 %v1027_v0  ;;  %v343_v30 = vld [vmem:[#allocation8 + $0x18] sm:$0xff]  ;;  %v342_v31 = vld [vmem:[#allocation8 + $0x10] sm:$0xff]  ;;  %v341_v32 = vld [vmem:[#allocation8 + $0x8] sm:$0xff] }
  0x57   : > { %706 = vmatpush3.msra.mxu0 %v335_v6  ;;  %741 = vmatpush3.msra.mxu1 %v351_v22  ;;  %v340_v33 = vld [vmem:[#allocation8] sm:$0xff]  ;;  %v658_v34 = vld [vmem:[%s1289_s2] ss:$0 sm:$0xff]  ;;  %p946_p5 = pnand %p945_p0, %p939_p11 }
  0x58   : > { %707 = vmatprep.subr.mxu0 %v1027_v0  ;;  %742 = vmatprep.subr.mxu1 %v1027_v0  ;;  %v657_v43 = vld [vmem:[%s1291_s4] ss:$0 sm:$0xff] }
  0x59   : > { %708 = vmatpush3.msra.mxu0 %v334_v9  ;;  %743 = vmatpush3.msra.mxu1 %v350_v23 }
  0x5a   : > { %709 = vmatprep.subr.mxu0 %v1027_v0  ;;  %744 = vmatprep.subr.mxu1 %v1027_v0 }
  0x5b   : > { %710 = vmatpush3.msra.mxu0 %v333_v11  ;;  %745 = vmatpush3.msra.mxu1 %v349_v24 }
  0x5c   : > { %711 = vmatprep.subr.mxu0 %v1027_v0  ;;  %746 = vmatprep.subr.mxu1 %v1027_v0 }
  0x5d   : > { %712 = vmatpush3.msra.mxu0 %v332_v12  ;;  %747 = vmatpush3.msra.mxu1 %v348_v25 }
  0x5e   : > { %713 = vmatprep.subr.mxu0 %v1027_v0  ;;  %748 = vmatprep.subr.mxu1 %v1027_v0 }
  0x5f   : > { %714 = vmatpush3.msra.mxu0 %v331_v13  ;;  %749 = vmatpush3.msra.mxu1 %v347_v26 }
  0x60   : > { %715 = vmatprep.subr.mxu0 %v1027_v0  ;;  %750 = vmatprep.subr.mxu1 %v1027_v0 }
  0x61   : > { %716 = vmatpush3.msra.mxu0 %v330_v14  ;;  %751 = vmatpush3.msra.mxu1 %v346_v27 }
  0x62   : > { %717 = vmatprep.subr.mxu0 %v1027_v0  ;;  %752 = vmatprep.subr.mxu1 %v1027_v0 }
  0x63   : > { %718 = vmatpush3.msra.mxu0 %v329_v15  ;;  %753 = vmatpush3.msra.mxu1 %v345_v28 }
  0x64   : > { %719 = vmatprep.subr.mxu0 %v1027_v0  ;;  %754 = vmatprep.subr.mxu1 %v1027_v0 }
  0x65   : > { %720 = vmatpush3.msra.mxu0 %v328_v16  ;;  %755 = vmatpush3.msra.mxu1 %v344_v29 }
  0x66   : > { %721 = vmatprep.subr.mxu0 %v1027_v0  ;;  %756 = vmatprep.subr.mxu1 %v1027_v0 }
  0x67   : > { %722 = vmatpush3.msra.mxu0 %v327_v17  ;;  %757 = vmatpush3.msra.mxu1 %v343_v30 }
  0x68   : > { %723 = vmatprep.subr.mxu0 %v1027_v0  ;;  %758 = vmatprep.subr.mxu1 %v1027_v0 }
  0x69   : > { %724 = vmatpush3.msra.mxu0 %v326_v18  ;;  %759 = vmatpush3.msra.mxu1 %v342_v31 }
  0x6a   : > { %725 = vmatprep.subr.mxu0 %v1027_v0  ;;  %760 = vmatprep.subr.mxu1 %v1027_v0 }
  0x6b   : > { %726 = vmatpush3.msra.mxu0 %v325_v19  ;;  %761 = vmatpush3.msra.mxu1 %v341_v32 }
  0x6c   : > { %727 = vmatprep.subr.mxu0 %v1027_v0  ;;  %762 = vmatprep.subr.mxu1 %v1027_v0 }
  0x6d   : > { %728 = vmatpush3.msra.mxu0 %v324_v20  ;;  %763 = vmatpush3.msra.mxu1 %v340_v33 }
  0x6e   : > { %730 = vmatmul.mubr.f32.vlgmr.msra.gmra.mxu0 %v323_v21 }
 0x12e   : > { %v429_v35 = vpop.f32.mrf.mxu0 }
 0x12f   : > { %v430_v36 = vadd.f32 %v658_v34, %v429_v35 }
 0x130   : > { %v731_v37 = vpop.f32.mrf.mxu0 }
 0x131   : > { %v434_v38 = vmul.f32 0.70710677, %v430_v36  ;;  %v433_v40 = vmul.f32 0.5, %v430_v36 }
 0x133   : > { %854 = verf.f32 %v434_v38 }
 0x140   : > { %v855_v39 = vpop.eup %854 }
 0x141   : > { %v436_v41 = vadd.f32 1.0, %v855_v39 }
 0x143   : > { %v437_v42 = vmul.f32 %v436_v41, %v433_v40 }
 0x145   : > { %765 = vmatmul.mubr.f32.vlgmr.msra.gmra.mxu1 %v437_v42 }
 0x205   : > { %v505_v44 = vpop.f32.mrf.mxu1 }
 0x206   : > { %v509_v45 = vadd.f32 %v657_v43, %v505_v44 }
 0x207   : > { %v766_v46 = vpop.f32.mrf.mxu1 }
 0x208   : > { %515 = vst [vmem:[%s306_s16] sm:$0xff] %v509_v45 }
 0x209   : > { %949 = shalt.err (!%p946_p5)
}
 0x20a   : > { %s950_s1 = scalar_lea.hbm %s1245_s8, 128  ;;  %s954_s28 = scalar_lea.hbm %s1292_s5, 256 }
 0x20b   : > { %p951_p10 = scmp.ne.s32.totalorder %s1245_s8, %s950_s1  ;;  %p955_p6 = scmp.lt.s32.totalorder %s1245_s8, %s1292_s5 }
 0x20c   : > { %p956_p12 = scmp.lt.s32.totalorder %s954_s28, %s950_s1 }
 0x20d   : > { %p952_p1 = pnand %p951_p10, %p1155_p7 }
 0x20e   : > { %p957_p3 = por %p956_p12, %p955_p6 }
 0x20f   : > { %p953_p4 = pneg %p952_p1 }
 0x211   : > { %p958_p8 = pnand %p957_p3, %p953_p4 }
 0x213   : > { %961 = shalt.err (!%p958_p8)
}
 0x214   : > { %777 = dma.vmem_to_hbm [thread:$0]  (%p1155_p7), %s531_s17, 128, %s1245_s8, %s517_s6  }
 0x215 PF: > { %s542_s15 = sand.u32 1, %s1000_s18   ;;  %p1308_p9 = scmp.ne.s32.totalorder %s1300_s29, 0 }
 0x216   : > { %p1309_p11 = scmp.ge.s32.totalorder %s1020_s23, 2  ;;  %s543_s16 = scalar_lea.sflag [#allocation5], %s542_s15 }
 0x218   : > { %p791_p2 = pnand %p1309_p11, %p1308_p9 }
 0x21a   : > { %p792_p13 = pneg %p791_p2 }
 0x21c   : > { %995 = dma.done.wait (%p792_p13), %s543_s16, 128  }
 0x21d   : > { %997 = vsyncadd (%p792_p13), %s543_s16, 4294967168  ;;  %s22_s23 = sadd.s32 1, %s1020_s23   ;;  %s1310_s18 = smov %s1004_s19 }
 0x21e   : > { %p19_p0 = scmp.ge.s32.totalorder %s22_s23, 4   ;;  %s1311_s19 = smov %s1008_s20 }
 0x21f   : > { %s1312_s20 = smov %s1164_s12  ;;  %s1313_s21 = smov %s1016_s22 }
 0x220   : > { %s1314_s22 = smov %s1316_s25  ;;  %21 = sbr.rel (!%p19_p0) target bundleno = 9 (0x9), region = 106 }
 0x225   :  { %548 = vsyncpa [#allocation4], 1 }
 0x226   :  { %550 = vsyncpa [#allocation4 + $0x1], 1 }
 0x227   :  { %551 = vsyncpa [#allocation7], 1 }
 0x228   :  { %552 = vsyncpa [#allocation5], 1 }
 0x229   :  { %554 = vsyncpa [#allocation5 + $0x1], 1 }

</bundles_post_ra>
